<compile_context>
chip_gen: v5e
topology: v5e:2x2
jax: 0.10.0
libtpu: 0.0.40
codegen_flags: <defaults>
</compile_context>

<pallas_src>
import functools

import numpy as np
import jax
import jax.numpy as jnp
from jax.experimental import pallas as pl
from jax.experimental.pallas import tpu as pltpu

_BN_EPS = 1e-5


# ----------------------------- Pallas kernel --------------------------------
def _unet_conv2_kernel(x_ref, w1_ref, b1_ref, w2_ref, b2_ref, o_ref, y1_ref,
                       *, W, L1, Lo):
    """Fused unetConv2 for one image.

    Layout (per image): channels on sublanes, flattened spatial (row-major
    h*W + w) on lanes.
      x_ref : (1, Ci, H*W + 4)   input, spatially flattened + 4 pad lanes
      w1_ref: (9, Cm, Ci)        per-tap conv1 matrices (BN folded)
      b1_ref: (Cm, 1)            conv1 bias (f32)
      w2_ref: (9, Co, Cm)        per-tap conv2 matrices (BN folded)
      b2_ref: (Co, 1)            conv2 bias (f32)
      o_ref : (1, Co, (H-4)*W)   flattened output (valid cols selected by caller)
      y1_ref: (Cm, (H-2)*W + 2)  VMEM scratch for the conv1 activation
    A valid 3x3 conv at flat position p = h*W + w is sum over taps (di, dj) of
    w_tap @ x[:, p + di*W + dj]; positions whose w wraps a row edge produce
    garbage that is never read by conv2's valid positions and is sliced away
    by the caller.
    """
    # ---- conv1 (+ folded BN) + bias + ReLU: nine shifted MXU dots, f32 acc ----
    acc1 = None
    for di in range(3):
        for dj in range(3):
            t = di * 3 + dj
            off = di * W + dj
            part = jnp.dot(w1_ref[t], x_ref[0, :, off:off + L1],
                           preferred_element_type=jnp.float32)
            acc1 = part if acc1 is None else acc1 + part
    # epilogue in f32; intermediate stays in VMEM only
    y1_ref[...] = jnp.maximum(acc1 + b1_ref[...], 0.0).astype(y1_ref.dtype)

    # ---- conv2 (+ folded BN) + bias + ReLU ----------------------------------
    acc2 = None
    for di in range(3):
        for dj in range(3):
            t = di * 3 + dj
            off = di * W + dj
            part = jnp.dot(w2_ref[t], y1_ref[:, off:off + Lo],
                           preferred_element_type=jnp.float32)
            acc2 = part if acc2 is None else acc2 + part
    o_ref[0] = jnp.maximum(acc2 + b2_ref[...], 0.0).astype(o_ref.dtype)


def _round_up(x, m):
    return ((x + m - 1) // m) * m


def unet_conv2_pallas(x, w1, b1, w2, b2, *, compute_dtype=jnp.float32):
    """unetConv2 forward (conv->bias->ReLU twice), valid padding, stride 1.

    x : (N, C_in, H, W) f32 (NCHW, as in PyTorch)
    w1: (C_mid, C_in, 3, 3), b1: (C_mid,)   [BN already folded if present]
    w2: (C_out, C_mid, 3, 3), b2: (C_out,)
    returns (N, C_out, H-4, W-4) f32.

    compute_dtype: dtype of the MXU operands (activations/weights).  Use
    jnp.bfloat16 on v6e/v7x to halve HBM bytes; keep f32 on v5e.  Accumulation
    and the bias/ReLU epilogue are always f32.
    """
    N, C_in, H, W = x.shape
    C_mid = w1.shape[0]
    C_out = w2.shape[0]
    assert H >= 5 and W >= 5, "two valid 3x3 convs need spatial size >= 5"

    # pad channel dims to sublane multiples (zeros contribute nothing)
    Ci = _round_up(C_in, 8)
    Cm = _round_up(C_mid, 8)
    Co = _round_up(C_out, 8)

    L = H * W
    L_pad = L + 4                 # +4 lanes so every tap slice stays in bounds
    L1 = (H - 2) * W + 2          # conv1 accumulation / scratch width
    Lo = (H - 4) * W              # conv2 / output width (lane-dense, >=128)

    # spatially-flattened, channel/lane-padded activations
    x_flat = jnp.pad(x.reshape(N, C_in, L).astype(compute_dtype),
                     ((0, 0), (0, Ci - C_in), (0, 4)))

    # (Cout, Cin, 3, 3) -> (9, Cout, Cin): one small matrix per tap
    w1_t = jnp.pad(jnp.transpose(w1, (2, 3, 0, 1)).reshape(9, C_mid, C_in),
                   ((0, 0), (0, Cm - C_mid), (0, Ci - C_in))).astype(compute_dtype)
    w2_t = jnp.pad(jnp.transpose(w2, (2, 3, 0, 1)).reshape(9, C_out, C_mid),
                   ((0, 0), (0, Co - C_out), (0, Cm - C_mid))).astype(compute_dtype)
    b1_c = jnp.pad(b1, (0, Cm - C_mid)).reshape(Cm, 1).astype(jnp.float32)
    b2_c = jnp.pad(b2, (0, Co - C_out)).reshape(Co, 1).astype(jnp.float32)

    kern = functools.partial(_unet_conv2_kernel, W=W, L1=L1, Lo=Lo)
    out_flat = pl.pallas_call(
        kern,
        out_shape=jax.ShapeDtypeStruct((N, Co, Lo), jnp.float32),
        grid=(N,),
        in_specs=[
            pl.BlockSpec((1, Ci, L_pad), lambda n: (n, 0, 0)),
            # constant index maps -> weights/bias stay VMEM-resident across steps
            pl.BlockSpec((9, Cm, Ci), lambda n: (0, 0, 0)),
            pl.BlockSpec((Cm, 1), lambda n: (0, 0)),
            pl.BlockSpec((9, Co, Cm), lambda n: (0, 0, 0)),
            pl.BlockSpec((Co, 1), lambda n: (0, 0)),
        ],
        out_specs=pl.BlockSpec((1, Co, Lo), lambda n: (n, 0, 0)),
        scratch_shapes=[pltpu.VMEM((Cm, L1), compute_dtype)],
        compiler_params=pltpu.CompilerParams(
            dimension_semantics=("parallel",),  # batch across cores on v7x
        ),
    )(x_flat, w1_t, b1_c, w2_t, b2_c)

    # flat (H-4)*W lanes -> (H-4, W); drop padded channels and invalid columns
    out = out_flat.reshape(N, Co, H - 4, W)[:, :C_out, :, :W - 4]
    return out


# ------------------------------ JAX glue -------------------------------------
def fold_bn(w, b, gamma, beta, mean, var):
    # TODO(synk): BatchNorm is applied in inference mode (running stats folded
    # into the conv); training-mode batch statistics are not reproduced.
    scale = gamma / jnp.sqrt(var + _BN_EPS)
    return w * scale[:, None, None, None], (b - mean) * scale + beta


def unet_conv2_forward(params, x, *, compute_dtype=jnp.float32):
    w1, b1, w2, b2 = params["w1"], params["b1"], params["w2"], params["b2"]
    if "bn1" in params:           # is_batchnorm=True branch of unetConv2
        w1, b1 = fold_bn(w1, b1, *params["bn1"])
        w2, b2 = fold_bn(w2, b2, *params["bn2"])
    return unet_conv2_pallas(x, w1, b1, w2, b2, compute_dtype=compute_dtype)


# ----------------------------- parameters ------------------------------------
def _conv_init(key, cin, cout):
    kw, kb = jax.random.split(key)
    bound = 1.0 / np.sqrt(cin * 9)
    w = jax.random.uniform(kw, (cout, cin, 3, 3), jnp.float32, -bound, bound)
    b = jax.random.uniform(kb, (cout,), jnp.float32, -bound, bound)
    return w, b


def _bn_init(key, c):
    kg, kb, km, kv = jax.random.split(key, 4)
    gamma = jax.random.uniform(kg, (c,), jnp.float32, 0.5, 1.5)
    beta = 0.1 * jax.random.normal(kb, (c,), jnp.float32)
    mean = 0.1 * jax.random.normal(km, (c,), jnp.float32)
    var = jax.random.uniform(kv, (c,), jnp.float32, 0.5, 1.5)
    return gamma, beta, mean, var


def init_unet_conv2_params(key, in_size, out_size, is_batchnorm=True):
    k1, k2, k3, k4 = jax.random.split(key, 4)
    w1, b1 = _conv_init(k1, in_size, out_size)
    w2, b2 = _conv_init(k2, out_size, out_size)
    params = {"w1": w1, "b1": b1, "w2": w2, "b2": b2}
    if is_batchnorm:
        params["bn1"] = _bn_init(k3, out_size)
        params["bn2"] = _bn_init(k4, out_size)
    return params


# ------------------------------ reference ------------------------------------
def reference_forward(params, x):
    def bn(y, gamma, beta, mean, var):
        inv = gamma / jnp.sqrt(var + _BN_EPS)
        return (y - mean[None, :, None, None]) * inv[None, :, None, None] \
            + beta[None, :, None, None]

    def block(x, w, b, bn_p):
        y = jax.lax.conv_general_dilated(
            x, w, (1, 1), "VALID",
            dimension_numbers=("NCHW", "OIHW", "NCHW")) + b[None, :, None, None]
        if bn_p is not None:
            y = bn(y, *bn_p)
        return jnp.maximum(y, 0.0)

    y = block(x, params["w1"], params["b1"], params.get("bn1"))
    y = block(y, params["w2"], params["b2"], params.get("bn2"))
    return y


if __name__ == "__main__":
    key = jax.random.PRNGKey(0)
    kx, kp = jax.random.split(key)
    N, C_in, H, W = 2, 4, 16, 16
    C_out = 8

    x = jax.random.normal(kx, (N, C_in, H, W), jnp.float32)
    params = init_unet_conv2_params(kp, C_in, C_out, is_batchnorm=True)

    fwd = jax.jit(unet_conv2_forward)
    y = jax.block_until_ready(fwd(params, x))
    assert y.shape == (N, C_out, H - 4, W - 4), y.shape
    assert bool(jnp.all(jnp.isfinite(y)))

    y_ref = reference_forward(params, x)
    err = float(jnp.max(jnp.abs(y - y_ref)))
    assert err < 1e-4, f"f32 mismatch vs reference: {err}"

    # bf16 MXU-operand path (the v6e/v7x recommendation); epilogue stays f32.
    fwd_bf16 = jax.jit(functools.partial(unet_conv2_forward,
                                         compute_dtype=jnp.bfloat16))
    y_bf16 = jax.block_until_ready(fwd_bf16(params, x))
    err_bf16 = float(jnp.max(jnp.abs(y_bf16 - y_ref)))
    assert err_bf16 < 1e-1, f"bf16 mismatch vs reference: {err_bf16}"

    print("KERNEL_OK")
</pallas_src>

<mosaic_0001>
module attributes {stable_mosaic.version = 11 : i64} {
  func.func @_unet_conv2_kernel(%arg0: i32, %arg1: memref<1x8x260xf32, #tpu.memory_space<vmem>>, %arg2: memref<9x8x8xf32, #tpu.memory_space<vmem>>, %arg3: memref<8x1xf32, #tpu.memory_space<vmem>>, %arg4: memref<9x8x8xf32, #tpu.memory_space<vmem>>, %arg5: memref<8x1xf32, #tpu.memory_space<vmem>>, %arg6: memref<1x8x192xf32, #tpu.memory_space<vmem>>, %arg7: memref<8x226xf32, #tpu.memory_space<vmem>>) attributes {dimension_semantics = [#tpu.dimension_semantics<parallel>], iteration_bounds = array<i64: 2>, scalar_prefetch = 0 : i64, scratch_operands = 1 : i64, tpu.core_type = #tpu.core_type<tc>, window_params = [{transform_indices = @transform_0, window_bounds = array<i64: 1, 8, 260>}, {pipeline_mode = #tpu.pipeline_mode<synchronous>, transform_indices = @transform_1, window_bounds = array<i64: 9, 8, 8>}, {pipeline_mode = #tpu.pipeline_mode<synchronous>, transform_indices = @transform_2, window_bounds = array<i64: 8, 1>}, {pipeline_mode = #tpu.pipeline_mode<synchronous>, transform_indices = @transform_3, window_bounds = array<i64: 9, 8, 8>}, {pipeline_mode = #tpu.pipeline_mode<synchronous>, transform_indices = @transform_4, window_bounds = array<i64: 8, 1>}, {transform_indices = @transform_5, window_bounds = array<i64: 1, 8, 192>}]} {
    %c0 = arith.constant 0 : index
    %c0_0 = arith.constant 0 : index
    %c0_1 = arith.constant 0 : index
    %0 = vector.load %arg2[%c0, %c0_0, %c0_1] : memref<9x8x8xf32, #tpu.memory_space<vmem>>, vector<1x8x8xf32>
    %1 = vector.shape_cast %0 : vector<1x8x8xf32> to vector<8x8xf32>
    %c0_2 = arith.constant 0 : index
    %c0_3 = arith.constant 0 : index
    %c0_4 = arith.constant 0 : index
    %2 = vector.load %arg1[%c0_2, %c0_3, %c0_4] : memref<1x8x260xf32, #tpu.memory_space<vmem>>, vector<1x8x226xf32>
    %3 = vector.shape_cast %2 : vector<1x8x226xf32> to vector<8x226xf32>
    %cst = arith.constant dense<0.000000e+00> : vector<8x226xf32>
    %4 = tpu.matmul %1, %3, %cst {dimension_numbers = #tpu.dot_dimension_numbers<[1], [0], [0], [1], [0, 0, 1, 1], [], []>} : vector<8x8xf32>, vector<8x226xf32>, vector<8x226xf32> -> vector<8x226xf32>
    %c1 = arith.constant 1 : index
    %c0_5 = arith.constant 0 : index
    %c0_6 = arith.constant 0 : index
    %5 = vector.load %arg2[%c1, %c0_5, %c0_6] : memref<9x8x8xf32, #tpu.memory_space<vmem>>, vector<1x8x8xf32>
    %6 = vector.shape_cast %5 : vector<1x8x8xf32> to vector<8x8xf32>
    %c0_7 = arith.constant 0 : index
    %c0_8 = arith.constant 0 : index
    %c1_9 = arith.constant 1 : index
    %7 = vector.load %arg1[%c0_7, %c0_8, %c1_9] : memref<1x8x260xf32, #tpu.memory_space<vmem>>, vector<1x8x226xf32>
    %8 = vector.shape_cast %7 : vector<1x8x226xf32> to vector<8x226xf32>
    %cst_10 = arith.constant dense<0.000000e+00> : vector<8x226xf32>
    %9 = tpu.matmul %6, %8, %cst_10 {dimension_numbers = #tpu.dot_dimension_numbers<[1], [0], [0], [1], [0, 0, 1, 1], [], []>} : vector<8x8xf32>, vector<8x226xf32>, vector<8x226xf32> -> vector<8x226xf32>
    %10 = arith.addf %4, %9 : vector<8x226xf32>
    %c2 = arith.constant 2 : index
    %c0_11 = arith.constant 0 : index
    %c0_12 = arith.constant 0 : index
    %11 = vector.load %arg2[%c2, %c0_11, %c0_12] : memref<9x8x8xf32, #tpu.memory_space<vmem>>, vector<1x8x8xf32>
    %12 = vector.shape_cast %11 : vector<1x8x8xf32> to vector<8x8xf32>
    %c0_13 = arith.constant 0 : index
    %c0_14 = arith.constant 0 : index
    %c2_15 = arith.constant 2 : index
    %13 = vector.load %arg1[%c0_13, %c0_14, %c2_15] : memref<1x8x260xf32, #tpu.memory_space<vmem>>, vector<1x8x226xf32>
    %14 = vector.shape_cast %13 : vector<1x8x226xf32> to vector<8x226xf32>
    %cst_16 = arith.constant dense<0.000000e+00> : vector<8x226xf32>
    %15 = tpu.matmul %12, %14, %cst_16 {dimension_numbers = #tpu.dot_dimension_numbers<[1], [0], [0], [1], [0, 0, 1, 1], [], []>} : vector<8x8xf32>, vector<8x226xf32>, vector<8x226xf32> -> vector<8x226xf32>
    %16 = arith.addf %10, %15 : vector<8x226xf32>
    %c3 = arith.constant 3 : index
    %c0_17 = arith.constant 0 : index
    %c0_18 = arith.constant 0 : index
    %17 = vector.load %arg2[%c3, %c0_17, %c0_18] : memref<9x8x8xf32, #tpu.memory_space<vmem>>, vector<1x8x8xf32>
    %18 = vector.shape_cast %17 : vector<1x8x8xf32> to vector<8x8xf32>
    %c0_19 = arith.constant 0 : index
    %c0_20 = arith.constant 0 : index
    %c16 = arith.constant 16 : index
    %19 = vector.load %arg1[%c0_19, %c0_20, %c16] : memref<1x8x260xf32, #tpu.memory_space<vmem>>, vector<1x8x226xf32>
    %20 = vector.shape_cast %19 : vector<1x8x226xf32> to vector<8x226xf32>
    %cst_21 = arith.constant dense<0.000000e+00> : vector<8x226xf32>
    %21 = tpu.matmul %18, %20, %cst_21 {dimension_numbers = #tpu.dot_dimension_numbers<[1], [0], [0], [1], [0, 0, 1, 1], [], []>} : vector<8x8xf32>, vector<8x226xf32>, vector<8x226xf32> -> vector<8x226xf32>
    %22 = arith.addf %16, %21 : vector<8x226xf32>
    %c4 = arith.constant 4 : index
    %c0_22 = arith.constant 0 : index
    %c0_23 = arith.constant 0 : index
    %23 = vector.load %arg2[%c4, %c0_22, %c0_23] : memref<9x8x8xf32, #tpu.memory_space<vmem>>, vector<1x8x8xf32>
    %24 = vector.shape_cast %23 : vector<1x8x8xf32> to vector<8x8xf32>
    %c0_24 = arith.constant 0 : index
    %c0_25 = arith.constant 0 : index
    %c17 = arith.constant 17 : index
    %25 = vector.load %arg1[%c0_24, %c0_25, %c17] : memref<1x8x260xf32, #tpu.memory_space<vmem>>, vector<1x8x226xf32>
    %26 = vector.shape_cast %25 : vector<1x8x226xf32> to vector<8x226xf32>
    %cst_26 = arith.constant dense<0.000000e+00> : vector<8x226xf32>
    %27 = tpu.matmul %24, %26, %cst_26 {dimension_numbers = #tpu.dot_dimension_numbers<[1], [0], [0], [1], [0, 0, 1, 1], [], []>} : vector<8x8xf32>, vector<8x226xf32>, vector<8x226xf32> -> vector<8x226xf32>
    %28 = arith.addf %22, %27 : vector<8x226xf32>
    %c5 = arith.constant 5 : index
    %c0_27 = arith.constant 0 : index
    %c0_28 = arith.constant 0 : index
    %29 = vector.load %arg2[%c5, %c0_27, %c0_28] : memref<9x8x8xf32, #tpu.memory_space<vmem>>, vector<1x8x8xf32>
    %30 = vector.shape_cast %29 : vector<1x8x8xf32> to vector<8x8xf32>
    %c0_29 = arith.constant 0 : index
    %c0_30 = arith.constant 0 : index
    %c18 = arith.constant 18 : index
    %31 = vector.load %arg1[%c0_29, %c0_30, %c18] : memref<1x8x260xf32, #tpu.memory_space<vmem>>, vector<1x8x226xf32>
    %32 = vector.shape_cast %31 : vector<1x8x226xf32> to vector<8x226xf32>
    %cst_31 = arith.constant dense<0.000000e+00> : vector<8x226xf32>
    %33 = tpu.matmul %30, %32, %cst_31 {dimension_numbers = #tpu.dot_dimension_numbers<[1], [0], [0], [1], [0, 0, 1, 1], [], []>} : vector<8x8xf32>, vector<8x226xf32>, vector<8x226xf32> -> vector<8x226xf32>
    %34 = arith.addf %28, %33 : vector<8x226xf32>
    %c6 = arith.constant 6 : index
    %c0_32 = arith.constant 0 : index
    %c0_33 = arith.constant 0 : index
    %35 = vector.load %arg2[%c6, %c0_32, %c0_33] : memref<9x8x8xf32, #tpu.memory_space<vmem>>, vector<1x8x8xf32>
    %36 = vector.shape_cast %35 : vector<1x8x8xf32> to vector<8x8xf32>
    %c0_34 = arith.constant 0 : index
    %c0_35 = arith.constant 0 : index
    %c32 = arith.constant 32 : index
    %37 = vector.load %arg1[%c0_34, %c0_35, %c32] : memref<1x8x260xf32, #tpu.memory_space<vmem>>, vector<1x8x226xf32>
    %38 = vector.shape_cast %37 : vector<1x8x226xf32> to vector<8x226xf32>
    %cst_36 = arith.constant dense<0.000000e+00> : vector<8x226xf32>
    %39 = tpu.matmul %36, %38, %cst_36 {dimension_numbers = #tpu.dot_dimension_numbers<[1], [0], [0], [1], [0, 0, 1, 1], [], []>} : vector<8x8xf32>, vector<8x226xf32>, vector<8x226xf32> -> vector<8x226xf32>
    %40 = arith.addf %34, %39 : vector<8x226xf32>
    %c7 = arith.constant 7 : index
    %c0_37 = arith.constant 0 : index
    %c0_38 = arith.constant 0 : index
    %41 = vector.load %arg2[%c7, %c0_37, %c0_38] : memref<9x8x8xf32, #tpu.memory_space<vmem>>, vector<1x8x8xf32>
    %42 = vector.shape_cast %41 : vector<1x8x8xf32> to vector<8x8xf32>
    %c0_39 = arith.constant 0 : index
    %c0_40 = arith.constant 0 : index
    %c33 = arith.constant 33 : index
    %43 = vector.load %arg1[%c0_39, %c0_40, %c33] : memref<1x8x260xf32, #tpu.memory_space<vmem>>, vector<1x8x226xf32>
    %44 = vector.shape_cast %43 : vector<1x8x226xf32> to vector<8x226xf32>
    %cst_41 = arith.constant dense<0.000000e+00> : vector<8x226xf32>
    %45 = tpu.matmul %42, %44, %cst_41 {dimension_numbers = #tpu.dot_dimension_numbers<[1], [0], [0], [1], [0, 0, 1, 1], [], []>} : vector<8x8xf32>, vector<8x226xf32>, vector<8x226xf32> -> vector<8x226xf32>
    %46 = arith.addf %40, %45 : vector<8x226xf32>
    %c8 = arith.constant 8 : index
    %c0_42 = arith.constant 0 : index
    %c0_43 = arith.constant 0 : index
    %47 = vector.load %arg2[%c8, %c0_42, %c0_43] : memref<9x8x8xf32, #tpu.memory_space<vmem>>, vector<1x8x8xf32>
    %48 = vector.shape_cast %47 : vector<1x8x8xf32> to vector<8x8xf32>
    %c0_44 = arith.constant 0 : index
    %c0_45 = arith.constant 0 : index
    %c34 = arith.constant 34 : index
    %49 = vector.load %arg1[%c0_44, %c0_45, %c34] : memref<1x8x260xf32, #tpu.memory_space<vmem>>, vector<1x8x226xf32>
    %50 = vector.shape_cast %49 : vector<1x8x226xf32> to vector<8x226xf32>
    %cst_46 = arith.constant dense<0.000000e+00> : vector<8x226xf32>
    %51 = tpu.matmul %48, %50, %cst_46 {dimension_numbers = #tpu.dot_dimension_numbers<[1], [0], [0], [1], [0, 0, 1, 1], [], []>} : vector<8x8xf32>, vector<8x226xf32>, vector<8x226xf32> -> vector<8x226xf32>
    %52 = arith.addf %46, %51 : vector<8x226xf32>
    %c0_47 = arith.constant 0 : index
    %c0_48 = arith.constant 0 : index
    %53 = vector.load %arg3[%c0_47, %c0_48] : memref<8x1xf32, #tpu.memory_space<vmem>>, vector<8x1xf32>
    %54 = vector.broadcast %53 : vector<8x1xf32> to vector<8x226xf32>
    %55 = arith.addf %52, %54 : vector<8x226xf32>
    %cst_49 = arith.constant 0.000000e+00 : f32
    %56 = vector.broadcast %cst_49 : f32 to vector<8x226xf32>
    %57 = arith.maximumf %55, %56 : vector<8x226xf32>
    %c0_50 = arith.constant 0 : index
    %c0_51 = arith.constant 0 : index
    %58 = vector.load %arg7[%c0_50, %c0_51] : memref<8x226xf32, #tpu.memory_space<vmem>>, vector<8x226xf32>
    tpu.vector_store %arg7[%c0_50, %c0_51], %57 {strides = array<i32>} : memref<8x226xf32, #tpu.memory_space<vmem>>, vector<8x226xf32>,
    %c0_52 = arith.constant 0 : index
    %c0_53 = arith.constant 0 : index
    %c0_54 = arith.constant 0 : index
    %59 = vector.load %arg4[%c0_52, %c0_53, %c0_54] : memref<9x8x8xf32, #tpu.memory_space<vmem>>, vector<1x8x8xf32>
    %60 = vector.shape_cast %59 : vector<1x8x8xf32> to vector<8x8xf32>
    %c0_55 = arith.constant 0 : index
    %c0_56 = arith.constant 0 : index
    %61 = vector.load %arg7[%c0_55, %c0_56] : memref<8x226xf32, #tpu.memory_space<vmem>>, vector<8x192xf32>
    %cst_57 = arith.constant dense<0.000000e+00> : vector<8x192xf32>
    %62 = tpu.matmul %60, %61, %cst_57 {dimension_numbers = #tpu.dot_dimension_numbers<[1], [0], [0], [1], [0, 0, 1, 1], [], []>} : vector<8x8xf32>, vector<8x192xf32>, vector<8x192xf32> -> vector<8x192xf32>
    %c1_58 = arith.constant 1 : index
    %c0_59 = arith.constant 0 : index
    %c0_60 = arith.constant 0 : index
    %63 = vector.load %arg4[%c1_58, %c0_59, %c0_60] : memref<9x8x8xf32, #tpu.memory_space<vmem>>, vector<1x8x8xf32>
    %64 = vector.shape_cast %63 : vector<1x8x8xf32> to vector<8x8xf32>
    %c0_61 = arith.constant 0 : index
    %c1_62 = arith.constant 1 : index
    %65 = vector.load %arg7[%c0_61, %c1_62] : memref<8x226xf32, #tpu.memory_space<vmem>>, vector<8x192xf32>
    %cst_63 = arith.constant dense<0.000000e+00> : vector<8x192xf32>
    %66 = tpu.matmul %64, %65, %cst_63 {dimension_numbers = #tpu.dot_dimension_numbers<[1], [0], [0], [1], [0, 0, 1, 1], [], []>} : vector<8x8xf32>, vector<8x192xf32>, vector<8x192xf32> -> vector<8x192xf32>
    %67 = arith.addf %62, %66 : vector<8x192xf32>
    %c2_64 = arith.constant 2 : index
    %c0_65 = arith.constant 0 : index
    %c0_66 = arith.constant 0 : index
    %68 = vector.load %arg4[%c2_64, %c0_65, %c0_66] : memref<9x8x8xf32, #tpu.memory_space<vmem>>, vector<1x8x8xf32>
    %69 = vector.shape_cast %68 : vector<1x8x8xf32> to vector<8x8xf32>
    %c0_67 = arith.constant 0 : index
    %c2_68 = arith.constant 2 : index
    %70 = vector.load %arg7[%c0_67, %c2_68] : memref<8x226xf32, #tpu.memory_space<vmem>>, vector<8x192xf32>
    %cst_69 = arith.constant dense<0.000000e+00> : vector<8x192xf32>
    %71 = tpu.matmul %69, %70, %cst_69 {dimension_numbers = #tpu.dot_dimension_numbers<[1], [0], [0], [1], [0, 0, 1, 1], [], []>} : vector<8x8xf32>, vector<8x192xf32>, vector<8x192xf32> -> vector<8x192xf32>
    %72 = arith.addf %67, %71 : vector<8x192xf32>
    %c3_70 = arith.constant 3 : index
    %c0_71 = arith.constant 0 : index
    %c0_72 = arith.constant 0 : index
    %73 = vector.load %arg4[%c3_70, %c0_71, %c0_72] : memref<9x8x8xf32, #tpu.memory_space<vmem>>, vector<1x8x8xf32>
    %74 = vector.shape_cast %73 : vector<1x8x8xf32> to vector<8x8xf32>
    %c0_73 = arith.constant 0 : index
    %c16_74 = arith.constant 16 : index
    %75 = vector.load %arg7[%c0_73, %c16_74] : memref<8x226xf32, #tpu.memory_space<vmem>>, vector<8x192xf32>
    %cst_75 = arith.constant dense<0.000000e+00> : vector<8x192xf32>
    %76 = tpu.matmul %74, %75, %cst_75 {dimension_numbers = #tpu.dot_dimension_numbers<[1], [0], [0], [1], [0, 0, 1, 1], [], []>} : vector<8x8xf32>, vector<8x192xf32>, vector<8x192xf32> -> vector<8x192xf32>
    %77 = arith.addf %72, %76 : vector<8x192xf32>
    %c4_76 = arith.constant 4 : index
    %c0_77 = arith.constant 0 : index
    %c0_78 = arith.constant 0 : index
    %78 = vector.load %arg4[%c4_76, %c0_77, %c0_78] : memref<9x8x8xf32, #tpu.memory_space<vmem>>, vector<1x8x8xf32>
    %79 = vector.shape_cast %78 : vector<1x8x8xf32> to vector<8x8xf32>
    %c0_79 = arith.constant 0 : index
    %c17_80 = arith.constant 17 : index
    %80 = vector.load %arg7[%c0_79, %c17_80] : memref<8x226xf32, #tpu.memory_space<vmem>>, vector<8x192xf32>
    %cst_81 = arith.constant dense<0.000000e+00> : vector<8x192xf32>
    %81 = tpu.matmul %79, %80, %cst_81 {dimension_numbers = #tpu.dot_dimension_numbers<[1], [0], [0], [1], [0, 0, 1, 1], [], []>} : vector<8x8xf32>, vector<8x192xf32>, vector<8x192xf32> -> vector<8x192xf32>
    %82 = arith.addf %77, %81 : vector<8x192xf32>
    %c5_82 = arith.constant 5 : index
    %c0_83 = arith.constant 0 : index
    %c0_84 = arith.constant 0 : index
    %83 = vector.load %arg4[%c5_82, %c0_83, %c0_84] : memref<9x8x8xf32, #tpu.memory_space<vmem>>, vector<1x8x8xf32>
    %84 = vector.shape_cast %83 : vector<1x8x8xf32> to vector<8x8xf32>
    %c0_85 = arith.constant 0 : index
    %c18_86 = arith.constant 18 : index
    %85 = vector.load %arg7[%c0_85, %c18_86] : memref<8x226xf32, #tpu.memory_space<vmem>>, vector<8x192xf32>
    %cst_87 = arith.constant dense<0.000000e+00> : vector<8x192xf32>
    %86 = tpu.matmul %84, %85, %cst_87 {dimension_numbers = #tpu.dot_dimension_numbers<[1], [0], [0], [1], [0, 0, 1, 1], [], []>} : vector<8x8xf32>, vector<8x192xf32>, vector<8x192xf32> -> vector<8x192xf32>
    %87 = arith.addf %82, %86 : vector<8x192xf32>
    %c6_88 = arith.constant 6 : index
    %c0_89 = arith.constant 0 : index
    %c0_90 = arith.constant 0 : index
    %88 = vector.load %arg4[%c6_88, %c0_89, %c0_90] : memref<9x8x8xf32, #tpu.memory_space<vmem>>, vector<1x8x8xf32>
    %89 = vector.shape_cast %88 : vector<1x8x8xf32> to vector<8x8xf32>
    %c0_91 = arith.constant 0 : index
    %c32_92 = arith.constant 32 : index
    %90 = vector.load %arg7[%c0_91, %c32_92] : memref<8x226xf32, #tpu.memory_space<vmem>>, vector<8x192xf32>
    %cst_93 = arith.constant dense<0.000000e+00> : vector<8x192xf32>
    %91 = tpu.matmul %89, %90, %cst_93 {dimension_numbers = #tpu.dot_dimension_numbers<[1], [0], [0], [1], [0, 0, 1, 1], [], []>} : vector<8x8xf32>, vector<8x192xf32>, vector<8x192xf32> -> vector<8x192xf32>
    %92 = arith.addf %87, %91 : vector<8x192xf32>
    %c7_94 = arith.constant 7 : index
    %c0_95 = arith.constant 0 : index
    %c0_96 = arith.constant 0 : index
    %93 = vector.load %arg4[%c7_94, %c0_95, %c0_96] : memref<9x8x8xf32, #tpu.memory_space<vmem>>, vector<1x8x8xf32>
    %94 = vector.shape_cast %93 : vector<1x8x8xf32> to vector<8x8xf32>
    %c0_97 = arith.constant 0 : index
    %c33_98 = arith.constant 33 : index
    %95 = vector.load %arg7[%c0_97, %c33_98] : memref<8x226xf32, #tpu.memory_space<vmem>>, vector<8x192xf32>
    %cst_99 = arith.constant dense<0.000000e+00> : vector<8x192xf32>
    %96 = tpu.matmul %94, %95, %cst_99 {dimension_numbers = #tpu.dot_dimension_numbers<[1], [0], [0], [1], [0, 0, 1, 1], [], []>} : vector<8x8xf32>, vector<8x192xf32>, vector<8x192xf32> -> vector<8x192xf32>
    %97 = arith.addf %92, %96 : vector<8x192xf32>
    %c8_100 = arith.constant 8 : index
    %c0_101 = arith.constant 0 : index
    %c0_102 = arith.constant 0 : index
    %98 = vector.load %arg4[%c8_100, %c0_101, %c0_102] : memref<9x8x8xf32, #tpu.memory_space<vmem>>, vector<1x8x8xf32>
    %99 = vector.shape_cast %98 : vector<1x8x8xf32> to vector<8x8xf32>
    %c0_103 = arith.constant 0 : index
    %c34_104 = arith.constant 34 : index
    %100 = vector.load %arg7[%c0_103, %c34_104] : memref<8x226xf32, #tpu.memory_space<vmem>>, vector<8x192xf32>
    %cst_105 = arith.constant dense<0.000000e+00> : vector<8x192xf32>
    %101 = tpu.matmul %99, %100, %cst_105 {dimension_numbers = #tpu.dot_dimension_numbers<[1], [0], [0], [1], [0, 0, 1, 1], [], []>} : vector<8x8xf32>, vector<8x192xf32>, vector<8x192xf32> -> vector<8x192xf32>
    %102 = arith.addf %97, %101 : vector<8x192xf32>
    %c0_106 = arith.constant 0 : index
    %c0_107 = arith.constant 0 : index
    %103 = vector.load %arg5[%c0_106, %c0_107] : memref<8x1xf32, #tpu.memory_space<vmem>>, vector<8x1xf32>
    %104 = vector.broadcast %103 : vector<8x1xf32> to vector<8x192xf32>
    %105 = arith.addf %102, %104 : vector<8x192xf32>
    %cst_108 = arith.constant 0.000000e+00 : f32
    %106 = vector.broadcast %cst_108 : f32 to vector<8x192xf32>
    %107 = arith.maximumf %105, %106 : vector<8x192xf32>
    %c0_109 = arith.constant 0 : index
    %c0_110 = arith.constant 0 : index
    %c0_111 = arith.constant 0 : index
    %108 = vector.load %arg6[%c0_109, %c0_110, %c0_111] : memref<1x8x192xf32, #tpu.memory_space<vmem>>, vector<1x8x192xf32>
    %109 = vector.shape_cast %108 : vector<1x8x192xf32> to vector<8x192xf32>
    %110 = vector.shape_cast %107 : vector<8x192xf32> to vector<1x8x192xf32>
    tpu.vector_store %arg6[%c0_109, %c0_110, %c0_111], %110 {strides = array<i32>} : memref<1x8x192xf32, #tpu.memory_space<vmem>>, vector<1x8x192xf32>,
    return
  }
  func.func @transform_0(%arg0: i32) -> (i32, i32, i32) {
    %c0_i32 = arith.constant 0 : i32
    %c0_i32_0 = arith.constant 0 : i32
    %c0_i32_1 = arith.constant 0 : i32
    return %arg0, %c0_i32, %c0_i32_0 : i32, i32, i32
  }
  func.func @transform_1(%arg0: i32) -> (i32, i32, i32) {
    %c0_i32 = arith.constant 0 : i32
    %c0_i32_0 = arith.constant 0 : i32
    %c0_i32_1 = arith.constant 0 : i32
    %c0_i32_2 = arith.constant 0 : i32
    return %c0_i32, %c0_i32_0, %c0_i32_1 : i32, i32, i32
  }
  func.func @transform_2(%arg0: i32) -> (i32, i32) {
    %c0_i32 = arith.constant 0 : i32
    %c0_i32_0 = arith.constant 0 : i32
    %c0_i32_1 = arith.constant 0 : i32
    return %c0_i32, %c0_i32_0 : i32, i32
  }
  func.func @transform_3(%arg0: i32) -> (i32, i32, i32) {
    %c0_i32 = arith.constant 0 : i32
    %c0_i32_0 = arith.constant 0 : i32
    %c0_i32_1 = arith.constant 0 : i32
    %c0_i32_2 = arith.constant 0 : i32
    return %c0_i32, %c0_i32_0, %c0_i32_1 : i32, i32, i32
  }
  func.func @transform_4(%arg0: i32) -> (i32, i32) {
    %c0_i32 = arith.constant 0 : i32
    %c0_i32_0 = arith.constant 0 : i32
    %c0_i32_1 = arith.constant 0 : i32
    return %c0_i32, %c0_i32_0 : i32, i32
  }
  func.func @transform_5(%arg0: i32) -> (i32, i32, i32) {
    %c0_i32 = arith.constant 0 : i32
    %c0_i32_0 = arith.constant 0 : i32
    %c0_i32_1 = arith.constant 0 : i32
    return %arg0, %c0_i32, %c0_i32_0 : i32, i32, i32
  }
}

</mosaic_0001>

<bundles_post_ra>
// kernel: unet_conv2_forward.1
= control target key start
LH: loop header
LB: loop body
LE: loop exit
PB: predicated region body
PF: predicated region fallthrough
CT: control target
= control target key end

     0   :  { %s1496_s18 = smov 0   ;;  %s1651_s0 = inlined_call_operand.vmem [shape: f32[2,8,260], index: 0, kind: input, shape index: {}]   ;;  %s1652_s1 = inlined_call_operand.vmem [shape: f32[9,8,8], index: 1, kind: input, shape index: {}]   ;;  %s1653_s2 = inlined_call_operand.vmem [shape: f32[8,1], index: 2, kind: input, shape index: {}]   ;;  %s1654_s3 = inlined_call_operand.vmem [shape: f32[9,8,8], index: 3, kind: input, shape index: {}]   ;;  %s1655_s4 = inlined_call_operand.vmem [shape: f32[8,1], index: 4, kind: input, shape index: {}]   ;;  %s1656_s5 = inlined_call_operand.vmem [shape: f32[2,8,192], index: 5, kind: output, shape index: {}]  }
   0x1 LB: > { %s1286_s19 = sadd.s32 4294967295, %s1455_s18   ;;  %p1290_p0 = scmp.ge.s32.totalorder %s1455_s18, 1  ;;  %s1455_s18 = sphi %s1496_s18, %s15_s18  }
   0x2   : > { %p187_p1 = scmp.lt.s32.totalorder %s1455_s18, 3 }
   0x4   : > { %p188_p2 = pnand %p1290_p0, %p187_p1 }
   0x5   : > { %p215_p3 = scmp.lt.s32.totalorder (!%p188_p2), %s1286_s19, 1  ;;  %s1457_s26 = smov (!%p188_p2), 127  }
   0x6   : > { %191 = sbr.rel (%p188_p2) target bundleno = 602 (0x25a), region = 40  ;;  %s1458_s27 = smov (!%p188_p2), 112  }
   0x7   : > { %s1459_s28 = smov (!%p188_p2), 110   ;;  %s1460_s29 = smov (!%p188_p2), 126  }
   0x8   : > { %s1461_s30 = smov (!%p188_p2), 111   ;;  %s1462_s6 = smov (!%p188_p2), 96  }
   0x9   : > { %s1463_s7 = smov (!%p188_p2), 95   ;;  %s1464_s8 = smov (!%p188_p2), 94  }
   0xb   : > { %s1658_s19 = smov (!%p215_p3, %s1286_s19), 1  ;;  %v225_v0 = vld [vmem:[%s1652_s1] sm:$0xff]  ;;  %vm240_vm0 = vcmask 64512   ;;  %vm236_vm1 = vcmask 1039360   ;;  %vm388_vm2 = vcmask 916480   ;;  %v1294_v13 = vld [vmem:[%s1652_s1 + $0x8] sm:$0xff] }
   0xc   : > { %s1349_s20 = smul.u32 24, %s1658_s19  ;;  %v1302_v15 = vld [vmem:[%s1652_s1 + $0x18] sm:$0xff]  ;;  %vm498_vm3 = vcmask 900096   ;;  %v727_v20 = vld [vmem:[%s1653_s2] sm:$0xff]  ;;  %vm333_vm4 = vcmask 1031168   ;;  %v1465_v21 = vmov 0  }
   0xd   : > { %1407 = vset.pattern.permute.xlu2 %v1465_v21  ;;  %vm561_vm5 = vcmask 785408   ;;  %vm443_vm6 = vcmask 908288   ;;  %v1299_v30 = vld [vmem:[%s1652_s1 + $0x10] sm:$0xff]  ;;  %1448 = vset.pattern.permute.xlu0 %v1465_v21  ;;  %v1308_v31 = vld [vmem:[%s1652_s1 + $0x28] sm:$0xff]  ;;  %vm619_vm7 = vcmask 777216   ;;  %v1305_v41 = vld [vmem:[%s1652_s1 + $0x20] sm:$0xff] }
   0xe   : > { %s219_s23 = scalar_lea.vmem %s1651_s0, %s1349_s20  ;;  %v1314_v44 = vld [vmem:[%s1652_s1 + $0x38] sm:$0xff]  ;;  %vm677_vm8 = vcmask 769024   ;;  %v1311_v47 = vld [vmem:[%s1652_s1 + $0x30] sm:$0xff]  ;;  %v1317_v52 = vld [vmem:[%s1652_s1 + $0x40] sm:$0xff]  ;;  %vm738_vm9 = vcmask 801792   ;;  %s1348_s9 = sshll.u32 %s1658_s19, 4 }
   0xf   : > { %v226_v1 = vld [vmem:[%s219_s23] sm:$0xff]  ;;  %v227_v2 = vld [vmem:[%s219_s23 + $0x8] sm:$0xff]  ;;  %v551_v4 = vld [vmem:[%s219_s23 + $0x10] sm:$0xff]  ;;  %s224_s12 = scalar_lea.vmem %s1656_s5, %s1348_s9  ;;  %vm1229_vm10 = vcmask 523264  }
  0x10   : > { %v1367_v3 = vpack.i.bf16 %v227_v2, %v226_v1  ;;  %302 = vmatpush.msra.mxu2 %v226_v1  ;;  %322 = vmatpush.msra.mxu3 %v227_v2 }
  0x11   : > { %1297 = vmatmul.msk.f32.vlgmr.msra.gmra.mxu2 %vm240_vm0, %v225_v0  ;;  %1298 = vmatmul.msk.f32.vlgmr.msra.gmra.mxu3 %vm240_vm0, %v225_v0 }
  0x12   : > { %1368 = vrot.lane.b32.xlu0 %v1367_v3, %s1457_s26  ;;  %1378 = vrot.lane.b32.xlu1 %v1367_v3, %s1458_s27 }
  0x13   : > { %1388 = vrot.lane.b32.xlu2 %v1367_v3, %s1459_s28 }
  0x1a   : > { %1373 = vrot.lane.b32.xlu0 %v1367_v3, %s1460_s29  ;;  %1383 = vrot.lane.b32.xlu1 %v1367_v3, %s1461_s30 }
  0x1b   : > { %1393 = vrot.lane.b32.xlu2 %v1367_v3, %s1462_s6 }
  0x22   : > { %1398 = vrot.lane.b32.xlu1 %v1367_v3, %s1463_s7  ;;  %559 = vrot.lane.b32.xlu0 %v551_v4, %s1462_s6 }
  0x23   : > { %617 = vrot.lane.b32.xlu2 %v551_v4, %s1463_s7 }
  0x2a   : > { %1403 = vrot.lane.b32.xlu0 %v1367_v3, %s1464_s8  ;;  %675 = vrot.lane.b32.xlu1 %v551_v4, %s1464_s8 }
  0x2b   : > { %730 = vperm.xlu2 %1407, %v727_v20  }
  0x6d   : > { %v1389_v5 = vpop.permute.xlu2 %1388 }
  0x6e   : > { %v1391_v8 = vunpack.i.h.bf16 %v1389_v5  ;;  %v1390_v9 = vunpack.i.l.bf16 %v1389_v5 }
  0x70   : > { %v499_v19 = vsel %vm498_vm3, %v1390_v9, %v1391_v8 }
  0x75   : > { %v1394_v18 = vpop.permute.xlu2 %1393 }
  0x76   : > { %v1396_v24 = vunpack.i.h.bf16 %v1394_v18  ;;  %v1395_v25 = vunpack.i.l.bf16 %v1394_v18 }
  0x78   : > { %v562_v34 = vsel %vm561_vm5, %v1395_v25, %v1396_v24 }
  0x7d   : > { %v618_v35 = vpop.permute.xlu2 %617 }
  0x84   : > { %v1369_v6 = vpop.permute.xlu0 %1368  ;;  %v1379_v7 = vpop.permute.xlu1 %1378 }
  0x85   : > { %v1370_v10 = vunpack.i.l.bf16 %v1369_v6  ;;  %v1380_v11 = vunpack.i.l.bf16 %v1379_v7  ;;  %v1371_v12 = vunpack.i.h.bf16 %v1369_v6  ;;  %v1381_v14 = vunpack.i.h.bf16 %v1379_v7  ;;  %v731_v20 = vpop.permute.xlu2 %730 }
  0x87   : > { %279 = vmatpush.msra.mxu1 %v1371_v12  ;;  %v237_v16 = vsel %vm236_vm1, %v1370_v10, %v1371_v12  ;;  %430 = vmatpush.msrb.mxu3 %v1381_v14  ;;  %v389_v17 = vsel %vm388_vm2, %v1380_v11, %v1381_v14 }
  0x88   : > { %259 = vmatpush.msra.mxu0 %v237_v16  ;;  %1296 = vmatmul.msk.f32.vlgmr.msra.gmra.mxu1 %vm240_vm0, %v1294_v13 }
  0x89   : > { %1295 = vmatmul.msk.f32.vlgmr.msra.gmra.mxu0 %vm240_vm0, %v1294_v13  ;;  %1304 = vmatmul.msk.f32.vlgmr.msrb.gmra.mxu3 %vm240_vm0, %v1302_v15 }
  0x8a   : > { %410 = vmatpush.msrb.mxu2 %v389_v17  ;;  %540 = vmatpush.msra.mxu3 %v1391_v8 }
  0x8b   : > { %1303 = vmatmul.msk.f32.vlgmr.msrb.gmra.mxu2 %vm240_vm0, %v1302_v15 }
  0x8c   : > { %v1374_v22 = vpop.permute.xlu0 %1373  ;;  %v1384_v23 = vpop.permute.xlu1 %1383  ;;  %520 = vmatpush.msra.mxu2 %v499_v19 }
  0x8d   : > { %v1375_v26 = vunpack.i.l.bf16 %v1374_v22  ;;  %v1386_v27 = vunpack.i.h.bf16 %v1384_v23  ;;  %v1385_v28 = vunpack.i.l.bf16 %v1384_v23  ;;  %v1376_v29 = vunpack.i.h.bf16 %v1374_v22 }
  0x8f   : > { %375 = vmatpush.msrb.mxu1 %v1376_v29  ;;  %v334_v32 = vsel %vm333_vm4, %v1375_v26, %v1376_v29  ;;  %v444_v33 = vsel %vm443_vm6, %v1385_v28, %v1386_v27 }
  0x90   : > { %355 = vmatpush.msrb.mxu0 %v334_v32  ;;  %1301 = vmatmul.msk.f32.vlgmr.msrb.gmra.mxu1 %vm240_vm0, %v1299_v30 }
  0x91   : > { %1300 = vmatmul.msk.f32.vlgmr.msrb.gmra.mxu0 %vm240_vm0, %v1299_v30  ;;  %1310 = vmatmul.msk.f32.vlgmr.msra.gmra.mxu3 %vm240_vm0, %v1308_v31  ;;  %v1218_v30 = vld [vmem:[%s1655_s4] sm:$0xff] }
  0x92   : > { %485 = vmatpush.msra.mxu1 %v1386_v27  ;;  %465 = vmatpush.msra.mxu0 %v444_v33 }
  0x93   : > { %1309 = vmatmul.msk.f32.vlgmr.msra.gmra.mxu2 %vm240_vm0, %v1308_v31  ;;  %v740_v31 = vld [vmem:[%s1654_s3] sm:$0xff] }
  0x94   : > { %584 = vmatpush.msrb.mxu0 %v562_v34  ;;  %v1399_v36 = vpop.permute.xlu1 %1398  ;;  %v560_v37 = vpop.permute.xlu0 %559 }
  0x95   : > { %v1401_v38 = vunpack.i.h.bf16 %v1399_v36  ;;  %v1400_v39 = vunpack.i.l.bf16 %v1399_v36  ;;  %v563_v40 = vsel %vm561_vm5, %v1396_v24, %v560_v37  ;;  %v304_v53 = vpop.f32.mrf.mxu2  ;;  %v324_v55 = vpop.f32.mrf.mxu3 }
  0x96   : > { %604 = vmatpush.msrb.mxu1 %v563_v40 }
  0x97   : > { %v621_v42 = vsel %vm619_vm7, %v1401_v38, %v618_v35  ;;  %v620_v43 = vsel %vm619_vm7, %v1400_v39, %v1401_v38  ;;  %v1320_v39 = vld [vmem:[%s1654_s3 + $0x8] sm:$0xff] }
  0x98   : > { %1307 = vmatmul.msk.f32.vlgmr.msra.gmra.mxu1 %vm240_vm0, %v1305_v41  ;;  %662 = vmatpush.msrb.mxu3 %v621_v42 }
  0x99   : > { %1306 = vmatmul.msk.f32.vlgmr.msra.gmra.mxu0 %vm240_vm0, %v1305_v41  ;;  %642 = vmatpush.msrb.mxu2 %v620_v43 }
  0x9a   : > { %1316 = vmatmul.msk.f32.vlgmr.msrb.gmra.mxu3 %vm240_vm0, %v1314_v44 }
  0x9b   : > { %1315 = vmatmul.msk.f32.vlgmr.msrb.gmra.mxu2 %vm240_vm0, %v1314_v44 }
  0x9c   : > { %v1404_v45 = vpop.permute.xlu0 %1403  ;;  %v676_v46 = vpop.permute.xlu1 %675 }
  0x9d   : > { %v1406_v48 = vunpack.i.h.bf16 %v1404_v45  ;;  %v1405_v49 = vunpack.i.l.bf16 %v1404_v45 }
  0x9f   : > { %v679_v50 = vsel %vm677_vm8, %v1406_v48, %v676_v46  ;;  %v678_v51 = vsel %vm677_vm8, %v1405_v49, %v1406_v48 }
  0xa0   : > { %1313 = vmatmul.msk.f32.vlgmr.msrb.gmra.mxu1 %vm240_vm0, %v1311_v47  ;;  %700 = vmatpush.msra.mxu0 %v678_v51 }
  0xa1   : > { %1312 = vmatmul.msk.f32.vlgmr.msrb.gmra.mxu0 %vm240_vm0, %v1311_v47  ;;  %720 = vmatpush.msra.mxu1 %v679_v50 }
  0xa8   : > { %1319 = vmatmul.msk.f32.vlgmr.msra.gmra.mxu1 %vm240_vm0, %v1317_v52 }
  0xa9   : > { %1318 = vmatmul.msk.f32.vlgmr.msra.gmra.mxu0 %vm240_vm0, %v1317_v52 }
 0x105   : > { %v281_v54 = vpop.f32.mrf.mxu1 }
 0x106   : > { %v261_v56 = vpop.f32.mrf.mxu0  ;;  %v325_v62 = vadd.f32 %v324_v55, %v281_v54  ;;  %v1325_v54 = vld [vmem:[%s1654_s3 + $0x10] sm:$0xff] }
 0x107   : > { %v305_v61 = vadd.f32 %v304_v53, %v261_v56 }
 0x10c   : > { %v432_v58 = vpop.f32.mrf.mxu3 }
 0x10d   : > { %v377_v57 = vpop.f32.mrf.mxu1 }
 0x10e   : > { %v357_v59 = vpop.f32.mrf.mxu0  ;;  %v412_v60 = vpop.f32.mrf.mxu2  ;;  %v381_v63 = vadd.f32 %v377_v57, %v325_v62  ;;  %v1328_v57 = vld [vmem:[%s1654_s3 + $0x18] sm:$0xff] }
 0x10f   : > { %v380_v0 = vadd.f32 %v357_v59, %v305_v61 }
 0x110   : > { %v436_v4 = vadd.f32 %v432_v58, %v381_v63 }
 0x111   : > { %v435_v6 = vadd.f32 %v412_v60, %v380_v0 }
 0x114   : > { %v542_v3 = vpop.f32.mrf.mxu3 }
 0x115   : > { %v487_v1 = vpop.f32.mrf.mxu1 }
 0x116   : > { %v467_v2 = vpop.f32.mrf.mxu0  ;;  %v522_v5 = vpop.f32.mrf.mxu2  ;;  %v491_v7 = vadd.f32 %v487_v1, %v436_v4  ;;  %v1331_v1 = vld [vmem:[%s1654_s3 + $0x20] sm:$0xff]  ;;  %v1334_v4 = vld [vmem:[%s1654_s3 + $0x28] sm:$0xff] }
 0x117   : > { %v490_v8 = vadd.f32 %v467_v2, %v435_v6  ;;  %v1340_v6 = vld [vmem:[%s1654_s3 + $0x38] sm:$0xff] }
 0x118   : > { %v546_v10 = vadd.f32 %v542_v3, %v491_v7  ;;  %v1343_v7 = vld [vmem:[%s1654_s3 + $0x40] sm:$0xff] }
 0x119   : > { %v545_v12 = vadd.f32 %v522_v5, %v490_v8  ;;  %v1337_v5 = vld [vmem:[%s1654_s3 + $0x30] sm:$0xff] }
 0x11d   : > { %v606_v9 = vpop.f32.mrf.mxu1  ;;  %v664_v15 = vpop.f32.mrf.mxu3 }
 0x11e   : > { %v586_v11 = vpop.f32.mrf.mxu0  ;;  %v610_v13 = vadd.f32 %v606_v9, %v546_v10  ;;  %v644_v16 = vpop.f32.mrf.mxu2 }
 0x11f   : > { %v609_v14 = vadd.f32 %v586_v11, %v545_v12 }
 0x120   : > { %v668_v17 = vadd.f32 %v664_v15, %v610_v13 }
 0x121   : > { %v667_v18 = vadd.f32 %v644_v16, %v609_v14 }
 0x125   : > { %v722_v19 = vpop.f32.mrf.mxu1 }
 0x126   : > { %v726_v21 = vadd.f32 %v722_v19, %v668_v17  ;;  %v702_v22 = vpop.f32.mrf.mxu0 }
 0x127   : > { %v725_v23 = vadd.f32 %v702_v22, %v667_v18 }
 0x128   : > { %v734_v24 = vadd.f32 %v731_v20, %v726_v21 }
 0x129   : > { %v733_v25 = vadd.f32 %v731_v20, %v725_v23 }
 0x12a   : > { %v736_v26 = vmax.f32 %v734_v24, 0.0 }
 0x12b   : > { %v735_v27 = vmax.f32 %v733_v25, 0.0 }
 0x12c   : > { %739 = vst.msk [vmem:[#allocation2 + $0x8] sm:$0xff] %vm738_vm9, %v736_v26 }
 0x12d   : > { %815 = vmatpush.msrb.mxu0 %v735_v27 }
 0x12e   : > { %1323 = vmatmul.msk.f32.vlgmr.msrb.gmra.mxu0 %vm240_vm0, %v740_v31 }
 0x133   : > { %v742_v28 = vld [vmem:[#allocation2 + $0x8] sm:$0xff] }
 0x134   : > { %835 = vmatpush.msrb.mxu1 %v742_v28  ;;  %v1418_v29 = vpack.i.bf16 %v742_v28, %v735_v27 }
 0x135   : > { %1324 = vmatmul.msk.f32.vlgmr.msrb.gmra.mxu1 %vm240_vm0, %v740_v31 }
 0x136   : > { %1419 = vrot.lane.b32.xlu2 %v1418_v29, %s1461_s30  ;;  %1414 = vrot.lane.b32.xlu1 %v1418_v29, %s1460_s29 }
 0x137   : > { %1409 = vrot.lane.b32.xlu0 %v1418_v29, %s1457_s26 }
 0x13e   : > { %1434 = vrot.lane.b32.xlu2 %v1418_v29, %s1459_s28  ;;  %1429 = vrot.lane.b32.xlu1 %v1418_v29, %s1462_s6 }
 0x13f   : > { %1424 = vrot.lane.b32.xlu0 %v1418_v29, %s1458_s27 }
 0x146   : > { %1221 = vperm.xlu2 %1407, %v1218_v30   ;;  %1444 = vrot.lane.b32.xlu1 %v1418_v29, %s1463_s7 }
 0x147   : > { %1439 = vrot.lane.b32.xlu0 %v1418_v29, %s1464_s8 }
 0x190   : > { %v1420_v32 = vpop.permute.xlu2 %1419 }
 0x191   : > { %v1422_v40 = vunpack.i.h.bf16 %v1420_v32  ;;  %v1421_v41 = vunpack.i.l.bf16 %v1420_v32 }
 0x193   : > { %v954_v45 = vsel %vm443_vm6, %v1421_v41, %v1422_v40 }
 0x198   : > { %v1435_v44 = vpop.permute.xlu2 %1434 }
 0x199   : > { %v1437_v50 = vunpack.i.h.bf16 %v1435_v44  ;;  %v1436_v51 = vunpack.i.l.bf16 %v1435_v44 }
 0x19b   : > { %v1008_v58 = vsel %vm498_vm3, %v1436_v51, %v1437_v50 }
 0x1a8   : > { %v1415_v33 = vpop.permute.xlu1 %1414 }
 0x1a9   : > { %v1417_v34 = vunpack.i.h.bf16 %v1415_v33  ;;  %v1416_v35 = vunpack.i.l.bf16 %v1415_v33  ;;  %v1410_v36 = vpop.permute.xlu0 %1409 }
 0x1aa   : > { %v1412_v37 = vunpack.i.h.bf16 %v1410_v36  ;;  %v1411_v38 = vunpack.i.l.bf16 %v1410_v36 }
 0x1ab   : > { %v846_v43 = vsel %vm333_vm4, %v1416_v35, %v1417_v34  ;;  %v817_v11 = vpop.f32.mrf.mxu0 }
 0x1ac   : > { %792 = vmatpush.msra.mxu3 %v1412_v37  ;;  %v751_v42 = vsel %vm236_vm1, %v1411_v38, %v1412_v37 }
 0x1ad   : > { %772 = vmatpush.msra.mxu2 %v751_v42  ;;  %1322 = vmatmul.msk.f32.vlgmr.msra.gmra.mxu3 %vm240_vm0, %v1320_v39 }
 0x1ae   : > { %887 = vmatpush.msrb.mxu3 %v1417_v34  ;;  %1321 = vmatmul.msk.f32.vlgmr.msra.gmra.mxu2 %vm240_vm0, %v1320_v39 }
 0x1af   : > { %867 = vmatpush.msrb.mxu2 %v846_v43 }
 0x1b0   : > { %995 = vmatpush.msra.mxu3 %v1422_v40  ;;  %v1430_v46 = vpop.permute.xlu1 %1429  ;;  %v1222_v40 = vpop.permute.xlu2 %1221 }
 0x1b1   : > { %975 = vmatpush.msra.mxu2 %v954_v45  ;;  %v1432_v47 = vunpack.i.h.bf16 %v1430_v46  ;;  %v1431_v48 = vunpack.i.l.bf16 %v1430_v46  ;;  %v1425_v49 = vpop.permute.xlu0 %1424 }
 0x1b2   : > { %v1427_v52 = vunpack.i.h.bf16 %v1425_v49  ;;  %v1426_v53 = vunpack.i.l.bf16 %v1425_v49  ;;  %v837_v8 = vpop.f32.mrf.mxu1 }
 0x1b3   : > { %v1062_v56 = vsel %vm561_vm5, %v1431_v48, %v1432_v47 }
 0x1b4   : > { %941 = vmatpush.msra.mxu1 %v1427_v52  ;;  %v900_v55 = vsel %vm388_vm2, %v1426_v53, %v1427_v52 }
 0x1b5   : > { %1327 = vmatmul.msk.f32.vlgmr.msrb.gmra.mxu3 %vm240_vm0, %v1325_v54  ;;  %921 = vmatpush.msra.mxu0 %v900_v55 }
 0x1b6   : > { %1049 = vmatpush.msrb.mxu1 %v1437_v50  ;;  %1103 = vmatpush.msrb.mxu3 %v1432_v47 }
 0x1b7   : > { %1326 = vmatmul.msk.f32.vlgmr.msrb.gmra.mxu2 %vm240_vm0, %v1325_v54  ;;  %1029 = vmatpush.msrb.mxu0 %v1008_v58 }
 0x1b8   : > { %1083 = vmatpush.msrb.mxu2 %v1062_v56  ;;  %v1445_v59 = vpop.permute.xlu1 %1444  ;;  %1330 = vmatmul.msk.f32.vlgmr.msra.gmra.mxu1 %vm240_vm0, %v1328_v57 }
 0x1b9   : > { %v1447_v60 = vunpack.i.h.bf16 %v1445_v59  ;;  %v1446_v61 = vunpack.i.l.bf16 %v1445_v59  ;;  %v1440_v62 = vpop.permute.xlu0 %1439  ;;  %1329 = vmatmul.msk.f32.vlgmr.msra.gmra.mxu0 %vm240_vm0, %v1328_v57 }
 0x1ba   : > { %v1442_v63 = vunpack.i.h.bf16 %v1440_v62  ;;  %v1441_v0 = vunpack.i.l.bf16 %v1440_v62 }
 0x1bb   : > { %1157 = vmatpush.msra.mxu1 %v1447_v60  ;;  %v1116_v2 = vsel %vm619_vm7, %v1446_v61, %v1447_v60 }
 0x1bc   : > { %1137 = vmatpush.msra.mxu0 %v1116_v2  ;;  %v1170_v3 = vsel %vm677_vm8, %v1441_v0, %v1442_v63 }
 0x1bd   : > { %1333 = vmatmul.msk.f32.vlgmr.msra.gmra.mxu3 %vm240_vm0, %v1331_v1 }
 0x1be   : > { %1211 = vmatpush.msra.mxu3 %v1442_v63 }
 0x1bf   : > { %1332 = vmatmul.msk.f32.vlgmr.msra.gmra.mxu2 %vm240_vm0, %v1331_v1 }
 0x1c0   : > { %1191 = vmatpush.msra.mxu2 %v1170_v3  ;;  %1336 = vmatmul.msk.f32.vlgmr.msrb.gmra.mxu1 %vm240_vm0, %v1334_v4 }
 0x1c1   : > { %1335 = vmatmul.msk.f32.vlgmr.msrb.gmra.mxu0 %vm240_vm0, %v1334_v4 }
 0x1c5   : > { %1339 = vmatmul.msk.f32.vlgmr.msrb.gmra.mxu3 %vm240_vm0, %v1337_v5 }
 0x1c7   : > { %1338 = vmatmul.msk.f32.vlgmr.msrb.gmra.mxu2 %vm240_vm0, %v1337_v5 }
 0x1c8   : > { %1342 = vmatmul.msk.f32.vlgmr.msra.gmra.mxu1 %vm240_vm0, %v1340_v6 }
 0x1c9   : > { %1341 = vmatmul.msk.f32.vlgmr.msra.gmra.mxu0 %vm240_vm0, %v1340_v6 }
 0x1cd   : > { %1345 = vmatmul.msk.f32.vlgmr.msra.gmra.mxu3 %vm240_vm0, %v1343_v7 }
 0x1cf   : > { %1344 = vmatmul.msk.f32.vlgmr.msra.gmra.mxu2 %vm240_vm0, %v1343_v7 }
 0x230   : > { %v794_v9 = vpop.f32.mrf.mxu3 }
 0x231   : > { %v774_v10 = vpop.f32.mrf.mxu2  ;;  %v838_v16 = vadd.f32 %v837_v8, %v794_v9 }
 0x232   : > { %v818_v17 = vadd.f32 %v817_v11, %v774_v10 }
 0x235   : > { %v943_v13 = vpop.f32.mrf.mxu1 }
 0x236   : > { %v923_v15 = vpop.f32.mrf.mxu0 }
 0x238   : > { %v889_v12 = vpop.f32.mrf.mxu3 }
 0x239   : > { %v893_v18 = vadd.f32 %v889_v12, %v838_v16 }
 0x23a   : > { %v869_v14 = vpop.f32.mrf.mxu2 }
 0x23b   : > { %v892_v20 = vadd.f32 %v869_v14, %v818_v17  ;;  %v947_v23 = vadd.f32 %v943_v13, %v893_v18 }
 0x23d   : > { %v1051_v22 = vpop.f32.mrf.mxu1  ;;  %v946_v25 = vadd.f32 %v923_v15, %v892_v20 }
 0x23e   : > { %v1031_v24 = vpop.f32.mrf.mxu0 }
 0x240   : > { %v997_v19 = vpop.f32.mrf.mxu3 }
 0x241   : > { %v1001_v26 = vadd.f32 %v997_v19, %v947_v23 }
 0x242   : > { %v977_v21 = vpop.f32.mrf.mxu2 }
 0x243   : > { %v1000_v27 = vadd.f32 %v977_v21, %v946_v25  ;;  %v1055_v29 = vadd.f32 %v1051_v22, %v1001_v26 }
 0x245   : > { %v1054_v31 = vadd.f32 %v1031_v24, %v1000_v27  ;;  %v1159_v33 = vpop.f32.mrf.mxu1 }
 0x246   : > { %v1139_v35 = vpop.f32.mrf.mxu0 }
 0x248   : > { %v1105_v28 = vpop.f32.mrf.mxu3 }
 0x249   : > { %v1109_v32 = vadd.f32 %v1105_v28, %v1055_v29 }
 0x24a   : > { %v1085_v30 = vpop.f32.mrf.mxu2 }
 0x24b   : > { %v1108_v34 = vadd.f32 %v1085_v30, %v1054_v31  ;;  %v1163_v36 = vadd.f32 %v1159_v33, %v1109_v32 }
 0x24d   : > { %v1162_v38 = vadd.f32 %v1139_v35, %v1108_v34 }
 0x250   : > { %v1213_v37 = vpop.f32.mrf.mxu3 }
 0x251   : > { %v1217_v39 = vadd.f32 %v1213_v37, %v1163_v36 }
 0x252   : > { %v1193_v41 = vpop.f32.mrf.mxu2 }
 0x253   : > { %v1225_v42 = vadd.f32 %v1222_v40, %v1217_v39  ;;  %v1216_v43 = vadd.f32 %v1193_v41, %v1162_v38 }
 0x255   : > { %v1227_v44 = vmax.f32 %v1225_v42, 0.0  ;;  %v1224_v45 = vadd.f32 %v1222_v40, %v1216_v43 }
 0x257   : > { %v1226_v46 = vmax.f32 %v1224_v45, 0.0  ;;  %1230 = vst.msk [vmem:[%s224_s12 + $0x8] sm:$0xff] %vm1229_vm10, %v1227_v44 }
 0x259   : > { %1228 = vst [vmem:[%s224_s12] sm:$0xff] %v1226_v46 }
 0x25a PF: > { %s15_s18 = sadd.s32 1, %s1455_s18  }
 0x25b   : > { %p12_p4 = scmp.ge.s32.totalorder %s15_s18, 4  }
 0x25d   :  { %14 = sbr.rel (!%p12_p4) target bundleno = 1 (0x1), region = 86 }

</bundles_post_ra>
